<compile_context>
chip_gen: v6e
topology: v6e:2x2x1
jax: 0.10.0
libtpu: 0.0.40
codegen_flags: <defaults>
</compile_context>

<pallas_src>
import math

import jax
import jax.numpy as jnp
from jax.experimental import pallas as pl
from jax.experimental.pallas import tpu as pltpu


def _token_conv_kernel(x_ref, w_ref, o_ref):
    # x_ref: (TM, C_k) token tile, w_ref: (C_k, TN) = slice of W^T + I,
    # o_ref: (TM, TN).  Residual already folded into w_ref -> pure MXU matmul.
    o_ref[...] = jnp.dot(
        x_ref[...], w_ref[...], preferred_element_type=jnp.float32
    ).astype(o_ref.dtype)


def _round_up(n, m):
    return ((n + m - 1) // m) * m


def token_conv(x, weight, *, tm=None):
    """x: (B, L, C_in), weight: (C_out, C_in, 1) -> (B, L, C_out)."""
    B, L, C_in = x.shape
    C_out, C_in_w, K = weight.shape
    assert C_in_w == C_in
    assert K == 1, "only kernel_size=1 / padding=0 is implemented"
    assert C_out == C_in, "residual add requires out_channels == in_channels"

    rows = B * L
    dtype = x.dtype
    itemsize = jnp.dtype(dtype).itemsize
    sub = {2: 16, 1: 32}.get(itemsize, 8)  # min sublane tile per dtype

    # Effective weight with the residual folded in (f32 math, then cast).
    w_eff = weight[:, :, 0].astype(jnp.float32).T + jnp.eye(C_in, dtype=jnp.float32)

    # ---- layout selection ---------------------------------------------------
    # pack: small C dividing 128 -> lane-dense token packing, zero wasted bytes
    # else: C multiple of 128 -> use as is; otherwise pad channels to 128-mult.
    pack = (C_in < 128) and (128 % C_in == 0) and ((rows * C_in) % 128 == 0)
    if pack:
        fold = 128 // C_in
        rows_eff = (rows * C_in) // 128
        C_k = 128
        x2d = x.reshape(rows_eff, C_k)  # contiguous reshape: free
        w_mat = jnp.kron(jnp.eye(fold, dtype=jnp.float32), w_eff).astype(dtype)
    else:
        rows_eff = rows
        C_k = _round_up(max(C_in, 128), 128)
        x2d = x.reshape(rows, C_in)
        if C_k != C_in:
            x2d = jnp.pad(x2d, ((0, 0), (0, C_k - C_in)))
            w_mat = (
                jnp.zeros((C_k, C_k), jnp.float32)
                .at[:C_in, :C_in]
                .set(w_eff)
                .astype(dtype)
            )
        else:
            w_mat = w_eff.astype(dtype)

    # ---- output-channel tiling (only matters for large C) -------------------
    if C_k <= 2048:
        tn = C_k
    elif C_k % 512 == 0:
        tn = 512
    elif C_k % 256 == 0:
        tn = 256
    else:
        tn = 128
    n_blocks = C_k // tn

    # ---- per-generation VMEM budget / row tile ------------------------------
    kind = ""
    try:
        kind = jax.devices()[0].device_kind.lower()
    except Exception:
        pass
    big_vmem = ("v5" in kind) or ("v6" in kind)  # 128 MiB VMEM parts, 1 TC
    budget = (96 << 20) if big_vmem else (40 << 20)
    vmem_cap = (112 << 20) if big_vmem else (56 << 20)
    if tm is None:
        tm = 1024 if big_vmem else 512

    def _vmem_bytes(tm_):
        w_bufs = 1 if n_blocks == 1 else 2
        return (2 * tm_ * C_k + 2 * tm_ * tn + w_bufs * C_k * tn) * itemsize

    if rows_eff <= tm:
        if (not big_vmem) and rows_eff >= 2 * sub:
            # Multi-TC part (v7x): give both TensorCores a row tile.
            tm = _round_up(pl.cdiv(rows_eff, 2), sub)
        else:
            tm = rows_eff  # single block == full dim (always a legal block)
    else:
        tm = max(sub, (tm // sub) * sub)
        while tm > sub and _vmem_bytes(tm) > budget:
            tm = max(sub, (tm // 2 // sub) * sub)

    m_blocks = pl.cdiv(rows_eff, tm)
    grid = (m_blocks, n_blocks)

    w_spec_kwargs = {}
    if n_blocks == 1:
        # Grid-invariant weight block: fetched once, no need to double-buffer.
        w_spec_kwargs = dict(pipeline_mode=pl.Buffered(1))

    vmem_limit = int(min(max(_vmem_bytes(tm) + (8 << 20), 32 << 20), vmem_cap))

    out2d = pl.pallas_call(
        _token_conv_kernel,
        out_shape=jax.ShapeDtypeStruct((rows_eff, C_k), dtype),
        grid=grid,
        in_specs=[
            pl.BlockSpec((tm, C_k), lambda i, j: (i, 0)),
            pl.BlockSpec((C_k, tn), lambda i, j: (0, j), **w_spec_kwargs),
        ],
        out_specs=pl.BlockSpec((tm, tn), lambda i, j: (i, j)),
        compiler_params=pltpu.CompilerParams(
            dimension_semantics=("parallel", "parallel"),
            vmem_limit_bytes=vmem_limit,
        ),
        cost_estimate=pl.CostEstimate(
            flops=2 * rows_eff * C_k * C_k,
            bytes_accessed=(2 * rows_eff * C_k + C_k * C_k) * itemsize,
            transcendentals=0,
        ),
    )(x2d, w_mat)

    if pack:
        return out2d.reshape(B, L, C_in)
    if C_k != C_in:
        out2d = out2d[:, :C_out]
    return out2d.reshape(B, L, C_out)


if __name__ == "__main__":
    key = jax.random.PRNGKey(0)
    k_x, k_w = jax.random.split(key)

    B, L, C = 2, 8, 32  # batch, sequence length, channels (in == out)
    kernel_size = 1

    x = jax.random.normal(k_x, (B, L, C), dtype=jnp.float32)

    # Deterministic Conv1d-style init (kaiming-uniform-ish bound), no bias.
    bound = 1.0 / math.sqrt(C * kernel_size)
    weight = jax.random.uniform(
        k_w, (C, C, kernel_size), minval=-bound, maxval=bound, dtype=jnp.float32
    )

    token_conv_jit = jax.jit(token_conv)
    out = token_conv_jit(x, weight)
    out = jax.block_until_ready(out)

    # Reference: x + conv1d(k=1) == x + x @ W[:, :, 0].T
    ref = x + jnp.einsum("blc,oc->blo", x, weight[:, :, 0])
    assert out.shape == (B, L, C)
    assert jnp.allclose(out, ref, atol=1e-5, rtol=1e-5), float(
        jnp.max(jnp.abs(out - ref))
    )

    print("KERNEL_OK")
</pallas_src>

<mosaic_0001>
module attributes {stable_mosaic.version = 11 : i64} {
  func.func @_token_conv_kernel(%arg0: i32, %arg1: i32, %arg2: memref<4x128xf32, #tpu.memory_space<vmem>>, %arg3: memref<128x128xf32, #tpu.memory_space<vmem>>, %arg4: memref<4x128xf32, #tpu.memory_space<vmem>>) attributes {dimension_semantics = [#tpu.dimension_semantics<parallel>, #tpu.dimension_semantics<parallel>], iteration_bounds = array<i64: 1, 1>, scalar_prefetch = 0 : i64, scratch_operands = 0 : i64, tpu.core_type = #tpu.core_type<tc>, window_params = [{transform_indices = @transform_0, window_bounds = array<i64: 4, 128>}, {pipeline_mode = #tpu.pipeline_mode<synchronous>, transform_indices = @transform_1, window_bounds = array<i64: 128, 128>}, {transform_indices = @transform_2, window_bounds = array<i64: 4, 128>}]} {
    %c0 = arith.constant 0 : index
    %c0_0 = arith.constant 0 : index
    %0 = vector.load %arg2[%c0, %c0_0] : memref<4x128xf32, #tpu.memory_space<vmem>>, vector<4x128xf32>
    %c0_1 = arith.constant 0 : index
    %c0_2 = arith.constant 0 : index
    %1 = vector.load %arg3[%c0_1, %c0_2] : memref<128x128xf32, #tpu.memory_space<vmem>>, vector<128x128xf32>
    %cst = arith.constant dense<0.000000e+00> : vector<4x128xf32>
    %2 = tpu.matmul %0, %1, %cst {dimension_numbers = #tpu.dot_dimension_numbers<[1], [0], [0], [1], [0, 0, 1, 1], [], []>} : vector<4x128xf32>, vector<128x128xf32>, vector<4x128xf32> -> vector<4x128xf32>
    %c0_3 = arith.constant 0 : index
    %c0_4 = arith.constant 0 : index
    %3 = vector.load %arg4[%c0_3, %c0_4] : memref<4x128xf32, #tpu.memory_space<vmem>>, vector<4x128xf32>
    tpu.vector_store %arg4[%c0_3, %c0_4], %2 {strides = array<i32>} : memref<4x128xf32, #tpu.memory_space<vmem>>, vector<4x128xf32>,
    return
  }
  func.func @transform_0(%arg0: i32, %arg1: i32) -> (i32, i32) {
    %c0_i32 = arith.constant 0 : i32
    %c0_i32_0 = arith.constant 0 : i32
    return %arg0, %c0_i32 : i32, i32
  }
  func.func @transform_1(%arg0: i32, %arg1: i32) -> (i32, i32) {
    %c0_i32 = arith.constant 0 : i32
    %c0_i32_0 = arith.constant 0 : i32
    return %c0_i32, %arg1 : i32, i32
  }
  func.func @transform_2(%arg0: i32, %arg1: i32) -> (i32, i32) {
    %c0_i32 = arith.constant 0 : i32
    return %arg0, %arg1 : i32, i32
  }
}

</mosaic_0001>

<bundles_post_ra>
// kernel: token_conv.1
= control target key start
LH: loop header
LB: loop body
LE: loop exit
PB: predicated region body
PF: predicated region fallthrough
CT: control target
= control target key end

     0   :  { %v157_v0 = vmov 0.0   ;;  %vm158_vm0 = vmmov 0   ;;  %s228_s1 = inlined_call_operand.vmem [shape: f32[128,128], index: 1, kind: input, shape index: {}]   ;;  %s229_s0 = inlined_call_operand.vmem [shape: f32[4,128], index: 0, kind: input, shape index: {}]   ;;  %s230_s2 = inlined_call_operand.vmem [shape: f32[4,128], index: 2, kind: output, shape index: {}]  }
   0x1   :  { %120 = vmatprep.subr.mxu0 %v157_v0  ;;  %v27_v1 = vld [vmem:[%s228_s1 + $0x78] sm:$0xff]  ;;  %v26_v2 = vld [vmem:[%s228_s1 + $0x70] sm:$0xff]  ;;  %152 = vmatprep.mubr.msk.f32.mxu0 %vm158_vm0, %v157_v0  ;;  %v25_v3 = vld [vmem:[%s228_s1 + $0x68] sm:$0xff] }
   0x2   :  { %121 = vmatpush3.msra.mxu0 %v27_v1  ;;  %v24_v4 = vld [vmem:[%s228_s1 + $0x60] sm:$0xff]  ;;  %v23_v5 = vld [vmem:[%s228_s1 + $0x58] sm:$0xff]  ;;  %v22_v6 = vld [vmem:[%s228_s1 + $0x50] sm:$0xff] }
   0x3   :  { %122 = vmatprep.subr.mxu0 %v157_v0  ;;  %v21_v7 = vld [vmem:[%s228_s1 + $0x48] sm:$0xff]  ;;  %v20_v8 = vld [vmem:[%s228_s1 + $0x40] sm:$0xff]  ;;  %v19_v9 = vld [vmem:[%s228_s1 + $0x38] sm:$0xff] }
   0x4   :  { %123 = vmatpush3.msra.mxu0 %v26_v2  ;;  %v18_v10 = vld [vmem:[%s228_s1 + $0x30] sm:$0xff]  ;;  %v17_v11 = vld [vmem:[%s228_s1 + $0x28] sm:$0xff]  ;;  %v16_v12 = vld [vmem:[%s228_s1 + $0x20] sm:$0xff] }
   0x5   :  { %124 = vmatprep.subr.mxu0 %v157_v0  ;;  %v15_v13 = vld [vmem:[%s228_s1 + $0x18] sm:$0xff]  ;;  %v14_v14 = vld [vmem:[%s228_s1 + $0x10] sm:$0xff]  ;;  %v13_v15 = vld [vmem:[%s228_s1 + $0x8] sm:$0xff] }
   0x6   :  { %125 = vmatpush3.msra.mxu0 %v25_v3  ;;  %v12_v16 = vld [vmem:[%s228_s1] sm:$0xff] }
   0x7   :  { %126 = vmatprep.subr.mxu0 %v157_v0  ;;  %v11_v17 = vld [vmem:[%s229_s0] sm:$0xf] }
   0x8   :  { %127 = vmatpush3.msra.mxu0 %v24_v4 }
   0x9   :  { %128 = vmatprep.subr.mxu0 %v157_v0 }
   0xa   :  { %129 = vmatpush3.msra.mxu0 %v23_v5 }
   0xb   :  { %130 = vmatprep.subr.mxu0 %v157_v0 }
   0xc   :  { %131 = vmatpush3.msra.mxu0 %v22_v6 }
   0xd   :  { %132 = vmatprep.subr.mxu0 %v157_v0 }
   0xe   :  { %133 = vmatpush3.msra.mxu0 %v21_v7 }
   0xf   :  { %134 = vmatprep.subr.mxu0 %v157_v0 }
  0x10   :  { %135 = vmatpush3.msra.mxu0 %v20_v8 }
  0x11   :  { %136 = vmatprep.subr.mxu0 %v157_v0 }
  0x12   :  { %137 = vmatpush3.msra.mxu0 %v19_v9 }
  0x13   :  { %138 = vmatprep.subr.mxu0 %v157_v0 }
  0x14   :  { %139 = vmatpush3.msra.mxu0 %v18_v10 }
  0x15   :  { %140 = vmatprep.subr.mxu0 %v157_v0 }
  0x16   :  { %141 = vmatpush3.msra.mxu0 %v17_v11 }
  0x17   :  { %142 = vmatprep.subr.mxu0 %v157_v0 }
  0x18   :  { %143 = vmatpush3.msra.mxu0 %v16_v12 }
  0x19   :  { %144 = vmatprep.subr.mxu0 %v157_v0 }
  0x1a   :  { %145 = vmatpush3.msra.mxu0 %v15_v13 }
  0x1b   :  { %146 = vmatprep.subr.mxu0 %v157_v0 }
  0x1c   :  { %147 = vmatpush3.msra.mxu0 %v14_v14 }
  0x1d   :  { %148 = vmatprep.subr.mxu0 %v157_v0 }
  0x1e   :  { %149 = vmatpush3.msra.mxu0 %v13_v15 }
  0x1f   :  { %150 = vmatprep.subr.mxu0 %v157_v0 }
  0x20   :  { %151 = vmatpush3.msra.mxu0 %v12_v16 }
  0x21   :  { %153 = vmatmul.mubr.f32.vlgmr.msra.gmra.mxu0 %v11_v17 }
  0xe1   :  { %v94_v18 = vpop.f32.mrf.mxu0 }
  0xe2   :  { %98 = vst [vmem:[%s230_s2] sm:$0xf] %v94_v18 }
  0xe3   :  { %v154_v19 = vpop.f32.mrf.mxu0 }

</bundles_post_ra>
